<compile_context>
chip_gen: v6e
topology: v6e:2x2x1
jax: 0.10.0
libtpu: 0.0.40
codegen_flags: <defaults>
</compile_context>

<pallas_src>
import functools

import jax
import jax.numpy as jnp
from jax import lax
from jax.experimental import pallas as pl
from jax.experimental.pallas import tpu as pltpu

_EPS = 1e-12
_C = 7                              # channels per gripper row
_ROWS_PER_SLAB = 128                # batch rows packed into one slab row
_SLAB_W = _C * _ROWS_PER_SLAB       # 896 lanes (multiple of 128 -> lane dense)
_DEFAULT_BLOCK_ROWS = 1024          # 1024 * 896 * 4B ~= 3.5 MiB per f32 buffer
_VMEM_LIMIT = 48 * 1024 * 1024      # explicit scoped-VMEM headroom (all gens)


def _gripper_kernel(x_ref, o_ref, *, sigmoid: bool, clip: bool):
    x = x_ref[...].astype(jnp.float32)           # (R, 896) lane-dense tile
    w = x.shape[-1]                              # 896 (static)

    # ---- Hoisted lane->channel map & masks: built once at (1, W) and
    # broadcast by the selects, so mask construction is O(W), not O(R*W).
    # channel = lane % 7 via exact f32 arithmetic (fl(1/7) > 1/7 and
    # lane < 2^23, so floor never slips at multiples of 7); avoids vector
    # integer div/rem, which Mosaic may not lower.  Valid for W = 896.
    lane = lax.broadcasted_iota(jnp.int32, (1, w), 1).astype(jnp.float32)
    ch = lane - float(_C) * jnp.floor(lane * (1.0 / _C))   # exact in {0..6}
    mask_approach = ch < 2.5                               # channels 0..2
    mask_beta = jnp.logical_and(ch > 2.5, ch < 4.5)        # channels 3..4

    # ---- Per-group sum of squares via XLU lane rolls (adds on VALU only).
    # Zeros outside each group (and the >=5-lane gap to the same group of the
    # neighbouring 7-lane blocks) make the symmetric window sum equal the
    # group sum at every in-group lane; circular wrap only hits masked zeros.
    xsq = x * x
    a = jnp.where(mask_approach, xsq, 0.0)
    b = jnp.where(mask_beta, xsq, 0.0)
    sum_a = (a
             + pltpu.roll(a, 1, 1) + pltpu.roll(a, w - 1, 1)
             + pltpu.roll(a, 2, 1) + pltpu.roll(a, w - 2, 1))
    sum_b = b + pltpu.roll(b, 1, 1) + pltpu.roll(b, w - 1, 1)

    # ---- Single select chain + one EUP rsqrt:
    # s == group ||v||^2 on normalized lanes, 1.0 on dist/width lanes, so
    # x * rsqrt(max(s, eps^2)) == F.normalize on channels 0..4 and identity
    # on channels 5..6.
    s = jnp.where(mask_approach, sum_a, jnp.where(mask_beta, sum_b, 1.0))
    y = x * lax.rsqrt(jnp.maximum(s, _EPS * _EPS))

    if sigmoid or clip:
        mask_dw = ch > 4.5                                 # channels 5..6

    if sigmoid:
        # logistic rides the EUP slot; one select on the VALU data path.
        y = jnp.where(mask_dw, jax.nn.sigmoid(y), y)

    if clip:
        # Hoisted per-lane clamp bounds: the only per-row cost is one max and
        # one min; +/-inf on non-clipped lanes make them no-ops there.
        mask_dist = jnp.logical_and(ch > 4.5, ch < 5.5)    # channel 5
        lo = jnp.where(mask_dist, 0.05,
                       jnp.where(ch > 5.5, 0.0, -jnp.inf)).astype(jnp.float32)
        hi = jnp.where(mask_dw, 1.0, jnp.inf).astype(jnp.float32)
        y = jnp.minimum(jnp.maximum(y, lo), hi)

    o_ref[...] = y.astype(o_ref.dtype)


def _forward_ref(output, *, sigmoid: bool = False, clip: bool = False):
    """Pure-JAX forward mirroring the PyTorch module (also used for tails)."""
    approach = output[:, 0:3]
    approach = approach / jnp.maximum(
        jnp.linalg.norm(approach, axis=1, keepdims=True), _EPS)
    beta = output[:, 3:5]
    beta = beta / jnp.maximum(
        jnp.linalg.norm(beta, axis=1, keepdims=True), _EPS)
    dist = output[:, 5:6]
    width = output[:, 6:7]
    if sigmoid:
        dist = jax.nn.sigmoid(dist)
        width = jax.nn.sigmoid(width)
    if clip:
        dist = jnp.clip(dist, 0.05, 1.0)
        width = jnp.clip(width, 0.0, 1.0)
    return jnp.concatenate([approach, beta, dist, width], axis=1)


def gripper_grasp_regressor2(output, *, sigmoid: bool = False,
                             clip: bool = False,
                             block_rows: int = _DEFAULT_BLOCK_ROWS):
    """Pallas TPU implementation of GripperGraspRegressor2.forward."""
    assert output.ndim == 2 and output.shape[1] == _C, "expected (B, 7) input"
    B = output.shape[0]
    B_main = (B // _ROWS_PER_SLAB) * _ROWS_PER_SLAB

    # Tiny batches (< one 128-row slab) don't justify a kernel launch.
    if B_main == 0:
        return _forward_ref(output, sigmoid=sigmoid, clip=clip)

    # Kernel runs on the 128-row-aligned prefix only (no whole-array pad).
    main = output if B_main == B else output[:B_main]
    n_rows = B_main // _ROWS_PER_SLAB            # 896-lane slab rows

    # dtype-aware sublane packing for the second-to-last block dim:
    # f32 -> 8, bf16 -> 16, int8/fp8 -> 32.
    itemsize = jnp.dtype(output.dtype).itemsize
    row_mult = max(8, 32 // max(1, itemsize))

    if n_rows <= row_mult:
        block_rows = n_rows                      # single full-extent block
    else:
        # Ensure >= 2 grid blocks (v7x megacore sharding), rounded to the
        # sublane packing; cap at the requested block_rows.
        half = pl.cdiv(n_rows, 2)
        half = pl.cdiv(half, row_mult) * row_mult
        br = min(block_rows, half)
        block_rows = max(row_mult, (br // row_mult) * row_mult)
    num_blocks = pl.cdiv(n_rows, block_rows)     # last block may be partial

    slab = main.reshape(n_rows, _SLAB_W)         # row-major => free reshape
    kernel = functools.partial(_gripper_kernel, sigmoid=sigmoid, clip=clip)
    out_slab = pl.pallas_call(
        kernel,
        out_shape=jax.ShapeDtypeStruct(slab.shape, output.dtype),
        grid=(num_blocks,),
        in_specs=[pl.BlockSpec((block_rows, _SLAB_W), lambda i: (i, 0))],
        out_specs=pl.BlockSpec((block_rows, _SLAB_W), lambda i: (i, 0)),
        compiler_params=pltpu.CompilerParams(
            dimension_semantics=("parallel",),
            vmem_limit_bytes=_VMEM_LIMIT),
    )(slab)
    y_main = out_slab.reshape(B_main, _C)

    if B_main == B:
        return y_main
    # <128-row tail handled in pure JAX (cheaper than padding the whole array).
    y_tail = _forward_ref(output[B_main:], sigmoid=sigmoid, clip=clip)
    return jnp.concatenate([y_main, y_tail], axis=0)


if __name__ == "__main__":
    key = jax.random.PRNGKey(0)

    # Small batch, not a multiple of 128 -> exercises the kernel prefix +
    # pure-JAX tail path (no pad, no output slice).
    B = 200
    x = jax.random.normal(key, (B, _C), dtype=jnp.float32)

    # Default path (clip=False, sigmoid=False), as in the module defaults.
    y = jax.block_until_ready(gripper_grasp_regressor2(x))
    y_ref = _forward_ref(x)
    assert jnp.allclose(y, y_ref, atol=1e-5, rtol=1e-5), "default path mismatch"

    # sigmoid + clip branches.
    y2 = jax.block_until_ready(
        gripper_grasp_regressor2(x, sigmoid=True, clip=True))
    y2_ref = _forward_ref(x, sigmoid=True, clip=True)
    assert jnp.allclose(y2, y2_ref, atol=1e-5, rtol=1e-5), \
        "sigmoid/clip path mismatch"

    # Aligned batch, >= 2 grid blocks -> exercises the double-buffered,
    # megacore-shardable grid (block_rows capped to cdiv(n_rows, 2)).
    B2 = 4096
    x2 = jax.random.normal(jax.random.PRNGKey(0), (B2, _C), dtype=jnp.float32)
    y3 = jax.block_until_ready(gripper_grasp_regressor2(x2, sigmoid=True))
    y3_ref = _forward_ref(x2, sigmoid=True)
    assert jnp.allclose(y3, y3_ref, atol=1e-5, rtol=1e-5), \
        "multi-block path mismatch"

    print("KERNEL_OK")
</pallas_src>

<mosaic_0001>
module attributes {stable_mosaic.version = 11 : i64} {
  func.func @_gripper_kernel(%arg0: i32, %arg1: memref<1x896xf32, #tpu.memory_space<vmem>>, %arg2: memref<1x896xf32, #tpu.memory_space<vmem>>) attributes {dimension_semantics = [#tpu.dimension_semantics<parallel>], iteration_bounds = array<i64: 1>, scalar_prefetch = 0 : i64, scratch_operands = 0 : i64, tpu.core_type = #tpu.core_type<tc>, window_params = [{transform_indices = @transform_0, window_bounds = array<i64: 1, 896>}, {transform_indices = @transform_1, window_bounds = array<i64: 1, 896>}]} {
    %c0 = arith.constant 0 : index
    %c0_0 = arith.constant 0 : index
    %0 = vector.load %arg1[%c0, %c0_0] : memref<1x896xf32, #tpu.memory_space<vmem>>, vector<1x896xf32>
    %1 = tpu.iota {dimensions = array<i32: 1>} : vector<1x896xi32>
    %2 = arith.sitofp %1 : vector<1x896xi32> to vector<1x896xf32>
    %cst = arith.constant 0.142857149 : f32
    %3 = vector.broadcast %cst : f32 to vector<1x896xf32>
    %4 = arith.mulf %2, %3 : vector<1x896xf32>
    %5 = math.floor %4 : vector<1x896xf32>
    %cst_1 = arith.constant 7.000000e+00 : f32
    %6 = vector.broadcast %cst_1 : f32 to vector<1x896xf32>
    %7 = arith.mulf %6, %5 : vector<1x896xf32>
    %8 = arith.subf %2, %7 : vector<1x896xf32>
    %cst_2 = arith.constant 2.500000e+00 : f32
    %9 = vector.broadcast %cst_2 : f32 to vector<1x896xf32>
    %10 = arith.cmpf olt, %8, %9 : vector<1x896xf32>
    %cst_3 = arith.constant 2.500000e+00 : f32
    %11 = vector.broadcast %cst_3 : f32 to vector<1x896xf32>
    %12 = arith.cmpf ogt, %8, %11 : vector<1x896xf32>
    %cst_4 = arith.constant 4.500000e+00 : f32
    %13 = vector.broadcast %cst_4 : f32 to vector<1x896xf32>
    %14 = arith.cmpf olt, %8, %13 : vector<1x896xf32>
    %15 = arith.andi %12, %14 : vector<1x896xi1>
    %16 = arith.mulf %0, %0 : vector<1x896xf32>
    %cst_5 = arith.constant 0.000000e+00 : f32
    %17 = vector.broadcast %cst_5 : f32 to vector<1x896xf32>
    %18 = arith.select %10, %16, %17 : vector<1x896xi1>, vector<1x896xf32>
    %cst_6 = arith.constant 0.000000e+00 : f32
    %19 = vector.broadcast %cst_6 : f32 to vector<1x896xf32>
    %20 = arith.select %15, %16, %19 : vector<1x896xi1>, vector<1x896xf32>
    %c1_i32 = arith.constant 1 : i32
    %21 = tpu.dynamic_rotate %18 by %c1_i32 dim 1 : vector<1x896xf32>, i32 -> vector<1x896xf32>
    %22 = arith.addf %18, %21 : vector<1x896xf32>
    %c895_i32 = arith.constant 895 : i32
    %23 = tpu.dynamic_rotate %18 by %c895_i32 dim 1 : vector<1x896xf32>, i32 -> vector<1x896xf32>
    %24 = arith.addf %22, %23 : vector<1x896xf32>
    %c2_i32 = arith.constant 2 : i32
    %25 = tpu.dynamic_rotate %18 by %c2_i32 dim 1 : vector<1x896xf32>, i32 -> vector<1x896xf32>
    %26 = arith.addf %24, %25 : vector<1x896xf32>
    %c894_i32 = arith.constant 894 : i32
    %27 = tpu.dynamic_rotate %18 by %c894_i32 dim 1 : vector<1x896xf32>, i32 -> vector<1x896xf32>
    %28 = arith.addf %26, %27 : vector<1x896xf32>
    %c1_i32_7 = arith.constant 1 : i32
    %29 = tpu.dynamic_rotate %20 by %c1_i32_7 dim 1 : vector<1x896xf32>, i32 -> vector<1x896xf32>
    %30 = arith.addf %20, %29 : vector<1x896xf32>
    %c895_i32_8 = arith.constant 895 : i32
    %31 = tpu.dynamic_rotate %20 by %c895_i32_8 dim 1 : vector<1x896xf32>, i32 -> vector<1x896xf32>
    %32 = arith.addf %30, %31 : vector<1x896xf32>
    %cst_9 = arith.constant 1.000000e+00 : f32
    %33 = vector.broadcast %cst_9 : f32 to vector<1x896xf32>
    %34 = arith.select %15, %32, %33 : vector<1x896xi1>, vector<1x896xf32>
    %35 = arith.select %10, %28, %34 : vector<1x896xi1>, vector<1x896xf32>
    %cst_10 = arith.constant 1.000000e-24 : f32
    %36 = vector.broadcast %cst_10 : f32 to vector<1x896xf32>
    %37 = arith.maximumf %35, %36 : vector<1x896xf32>
    %38 = math.rsqrt %37 : vector<1x896xf32>
    %39 = arith.mulf %0, %38 : vector<1x896xf32>
    %c0_11 = arith.constant 0 : index
    %c0_12 = arith.constant 0 : index
    %40 = vector.load %arg2[%c0_11, %c0_12] : memref<1x896xf32, #tpu.memory_space<vmem>>, vector<1x896xf32>
    tpu.vector_store %arg2[%c0_11, %c0_12], %39 {strides = array<i32>} : memref<1x896xf32, #tpu.memory_space<vmem>>, vector<1x896xf32>,
    return
  }
  func.func @transform_0(%arg0: i32) -> (i32, i32) {
    %c0_i32 = arith.constant 0 : i32
    %c0_i32_0 = arith.constant 0 : i32
    return %arg0, %c0_i32 : i32, i32
  }
  func.func @transform_1(%arg0: i32) -> (i32, i32) {
    %c0_i32 = arith.constant 0 : i32
    %c0_i32_0 = arith.constant 0 : i32
    return %arg0, %c0_i32 : i32, i32
  }
}

</mosaic_0001>

<bundles_post_ra>
// kernel: tpu_custom_call.1
= control target key start
LH: loop header
LB: loop body
LE: loop exit
PB: predicated region body
PF: predicated region fallthrough
CT: control target
= control target key end

     0   :  { %6 = vsyncpa [#allocation3], 0  ;;  %s885_s0 = inlined_call_operand.hbm [shape: f32[1,896], index: 0, kind: input, shape index: {}]   ;;  %s886_s1 = inlined_call_operand.hbm [shape: f32[1,896], index: 1, kind: output, shape index: {}]  }
   0x1   :  { %7 = vsyncpa [#allocation4], 0  ;;  %s486_s6 = smov [#allocation2]  }
   0x2   :  { %s14_s7 = sshll.u32 %s486_s6, 4  ;;  %s15_s7 = int_to_ptr.vmem [resolvable:$true] %s14_s7 }
   0x3   :  { %s450_s8 = scalar_lea.vmem %s15_s7, 112  ;;  %s454_s9 = scalar_lea.vmem %s15_s7, 128 }
   0x4   :  { %p451_p0 = scmp.ne.s32.totalorder %s15_s7, %s450_s8  ;;  %p455_p1 = scmp.lt.s32.totalorder %s15_s7, %s15_s7 }
   0x5   :  { %p456_p2 = scmp.lt.s32.totalorder %s454_s9, %s450_s8 }
   0x7   :  { %p457_p3 = por %p456_p2, %p455_p1 }
   0x9   :  { %p458_p4 = pnand %p457_p3, %p451_p0 }
   0xb   :  { %461 = shalt.err (!%p458_p4)
}
   0xc   :  { %17 = dma.hbm_to_vmem [thread:$0]  %s885_s0, 112, %s15_s7, [#allocation3]  }
   0xd   :  { %482 = dma.done.wait [#allocation3], 112  }
   0xe   :  { %483 = vsyncadd [#allocation3], 4294967184  ;;  %v890_v0 = vlaneseq  ;;  %v520_v13 = vld [vmem:[#allocation2] sm:$0xff]  ;;  %s487_s0 = smov 127   ;;  %s488_s12 = smov 1  }
   0xf   :  { %897 = vst [vmem:[#allocation9_spill] sm:$0xff] %v520_v13  ;;  %v93_v18 = vmul.f32 %v520_v13, %v520_v13  ;;  %s489_s13 = smov 2   ;;  %s490_s14 = smov 126  }
  0x10   :  { %v507_v1 = vand.u32 127, %v890_v0  ;;  %v510_v2 = vshrl.u32 %v890_v0, 7  ;;  %s492_s15 = smov [#allocation5]  }
  0x11   :  { %s412_s16 = sshll.u32 %s492_s15, 4  ;;  %s413_s16 = int_to_ptr.vmem [resolvable:$true] %s412_s16 }
  0x12   :  { %896 = vst [vmem:[#allocation8_spill] sm:$0xff] %v510_v2  ;;  %v30_v3 = vcvt.s32.f32 %v507_v1  ;;  %v25_v4 = vadd.s32 256, %v507_v1  ;;  %v97_v5 = vsub.s32 0, %v510_v2  ;;  %v105_v6 = vsub.s32 2, %v510_v2  ;;  %s462_s17 = scalar_lea.vmem %s413_s16, 112  ;;  %s466_s18 = scalar_lea.vmem %s413_s16, 128 }
  0x13   :  { %v24_v7 = vadd.s32 128, %v507_v1  ;;  %v26_v8 = vadd.s32 384, %v507_v1  ;;  %v101_v11 = vsub.s32 1, %v510_v2  ;;  %v27_v12 = vadd.s32 512, %v507_v1  ;;  %p463_p5 = scmp.ne.s32.totalorder %s413_s16, %s462_s17  ;;  %p467_p6 = scmp.lt.s32.totalorder %s413_s16, %s413_s16 }
  0x14   :  { %v37_v9 = vmul.f32 0.14285715, %v30_v3  ;;  %v32_v10 = vcvt.s32.f32 %v25_v4  ;;  %v109_v16 = vsub.s32 3, %v510_v2  ;;  %v28_v17 = vadd.s32 640, %v507_v1  ;;  %p468_p7 = scmp.lt.s32.totalorder %s466_s18, %s462_s17 }
  0x15   :  { %v31_v14 = vcvt.s32.f32 %v24_v7  ;;  %v33_v15 = vcvt.s32.f32 %v26_v8  ;;  %v34_v21 = vcvt.s32.f32 %v27_v12  ;;  %v113_v24 = vsub.s32 4, %v510_v2 }
  0x16   :  { %v44_v19 = vfloor.f32 %v37_v9  ;;  %v39_v20 = vmul.f32 0.14285715, %v32_v10  ;;  %v35_v25 = vcvt.s32.f32 %v28_v17  ;;  %v117_v28 = vsub.s32 5, %v510_v2  ;;  %p469_p8 = por %p468_p7, %p467_p6 }
  0x17   :  { %v38_v22 = vmul.f32 0.14285715, %v31_v14  ;;  %v40_v23 = vmul.f32 0.14285715, %v33_v15  ;;  %v29_v29 = vadd.s32 768, %v507_v1  ;;  %v529_v30 = vrot.slane %v93_v18, %v97_v5 }
  0x18   :  { %v51_v26 = vmul.f32 7.0, %v44_v19  ;;  %v46_v27 = vfloor.f32 %v39_v20  ;;  %v531_v31 = vrot.slane %v93_v18, %v105_v6  ;;  %v535_v36 = vrot.slane %v93_v18, %v101_v11  ;;  %p470_p9 = pnand %p469_p8, %p463_p5 }
  0x19   :  { %v45_v32 = vfloor.f32 %v38_v22  ;;  %v47_v33 = vfloor.f32 %v40_v23  ;;  %v41_v37 = vmul.f32 0.14285715, %v34_v21  ;;  %v537_v40 = vrot.slane %v93_v18, %v109_v16 }
  0x1a   :  { %v533_v34 = vsub.f32 %v30_v3, %v51_v26  ;;  %v53_v35 = vmul.f32 7.0, %v46_v27  ;;  %v42_v41 = vmul.f32 0.14285715, %v35_v25  ;;  %v36_v44 = vcvt.s32.f32 %v29_v29 }
  0x1b   :  { %v52_v38 = vmul.f32 7.0, %v45_v32  ;;  %v54_v39 = vmul.f32 7.0, %v47_v33  ;;  %v48_v43 = vfloor.f32 %v41_v37  ;;  %v556_v50 = vrot.slane %v93_v18, %v113_v24 }
  0x1c   :  { %vm65_vm0 = vcmp.lt.f32.partialorder %v533_v34, 2.5  ;;  %v540_v42 = vsub.f32 %v32_v10, %v53_v35  ;;  %v49_v48 = vfloor.f32 %v42_v41  ;;  %v43_v51 = vmul.f32 0.14285715, %v36_v44 }
  0x1d   :  { %v545_v45 = vsel %vm65_vm0, %v529_v30, 0.0  ;;  %v547_v46 = vsub.f32 %v31_v14, %v52_v38  ;;  %v549_v47 = vsub.f32 %v33_v15, %v54_v39  ;;  %v55_v49 = vmul.f32 7.0, %v48_v43 }
  0x1e   :  { %173 = vrot.lane.b32.xlu1 %v545_v45, %s487_s0  ;;  %144 = vrot.lane.b32.xlu0 %v545_v45, %s488_s12  ;;  %vm67_vm1 = vcmp.lt.f32.partialorder %v540_v42, 2.5  ;;  %v56_v53 = vmul.f32 7.0, %v49_v48  ;;  %v121_v54 = vsub.s32 6, %v510_v2  ;;  %v50_v57 = vfloor.f32 %v43_v51 }
  0x1f   :  { %v561_v52 = vsel %vm67_vm1, %v531_v31, 0.0  ;;  %vm66_vm2 = vcmp.lt.f32.partialorder %v547_v46, 2.5  ;;  %vm68_vm3 = vcmp.lt.f32.partialorder %v549_v47, 2.5  ;;  %v571_v56 = vsub.f32 %v34_v21, %v55_v49 }
  0x20   :  { %v568_v55 = vsel %vm66_vm2, %v535_v36, 0.0  ;;  %v573_v58 = vsub.f32 %v35_v25, %v56_v53  ;;  %v57_v59 = vmul.f32 7.0, %v50_v57  ;;  %v583_v60 = vsel %vm68_vm3, %v537_v40, 0.0 }
  0x21   :  { %898 = vst [vmem:[#allocation10_spill] sm:$0xff] %v571_v56  ;;  %vm887_vm4 = vcmp.lt.f32.partialorder %v571_v56, 2.5  ;;  %v118_v62 = vrot.slane %v93_v18, %v117_v28  ;;  %v122_v63 = vrot.slane %v93_v18, %v121_v54  ;;  %vm73_vm7 = vcmp.gt.f32.partialorder %v547_v46, 2.5 }
  0x22   :  { %899 = vst [vmem:[#allocation11_spill] sm:$0xff] %v573_v58  ;;  %148 = vrot.lane.b32.xlu1 %v561_v52, %s488_s12  ;;  %146 = vrot.lane.b32.xlu0 %v568_v55, %s488_s12  ;;  %v588_v61 = vsel %vm887_vm4, %v556_v50, 0.0  ;;  %vm888_vm5 = vcmp.lt.f32.partialorder %v573_v58, 2.5  ;;  %v591_v3 = vsub.f32 %v36_v44, %v57_v59  ;;  %vm80_vm8 = vcmp.lt.f32.partialorder %v547_v46, 4.5 }
  0x23   :  { %v600_v4 = vsel %vm888_vm5, %v118_v62, 0.0  ;;  %vm72_vm9 = vcmp.gt.f32.partialorder %v533_v34, 2.5  ;;  %vm79_vm10 = vcmp.lt.f32.partialorder %v533_v34, 4.5  ;;  %vm622_vm11 = vmand %vm73_vm7, %vm80_vm8  ;;  %vm75_vm13 = vcmp.gt.f32.partialorder %v549_v47, 2.5 }
  0x24   :  { %900 = vst [vmem:[#allocation12_spill] sm:$0xff] %v591_v3  ;;  %vm889_vm6 = vcmp.lt.f32.partialorder %v591_v3, 2.5  ;;  %vm626_vm12 = vmand %vm72_vm9, %vm79_vm10  ;;  %vm82_vm14 = vcmp.lt.f32.partialorder %v549_v47, 4.5  ;;  %vm74_vm15 = vcmp.gt.f32.partialorder %v540_v42, 2.5  ;;  %vm81_vm4 = vcmp.lt.f32.partialorder %v540_v42, 4.5 }
  0x25   :  { %v604_v5 = vsel %vm889_vm6, %v122_v63, 0.0  ;;  %v641_v8 = vsel %vm622_vm11, %v535_v36, 0.0  ;;  %v646_v9 = vsel %vm626_vm12, %v529_v30, 0.0  ;;  %vm648_vm7 = vmand %vm75_vm13, %vm82_vm14  ;;  %vm77_vm9 = vcmp.gt.f32.partialorder %v573_v58, 2.5 }
  0x26   :  { %150 = vrot.lane.b32.xlu1 %v583_v60, %s488_s12  ;;  %152 = vrot.lane.b32.xlu0 %v588_v61, %s488_s12  ;;  %vm652_vm8 = vmand %vm74_vm15, %vm81_vm4  ;;  %vm84_vm10 = vcmp.lt.f32.partialorder %v573_v58, 4.5  ;;  %vm76_vm5 = vcmp.gt.f32.partialorder %v571_v56, 2.5  ;;  %vm83_vm6 = vcmp.lt.f32.partialorder %v571_v56, 4.5  ;;  %v667_v12 = vsel %vm648_vm7, %v537_v40, 0.0 }
  0x27   :  { %v672_v14 = vsel %vm652_vm8, %v531_v31, 0.0  ;;  %vm674_vm4 = vmand %vm77_vm9, %vm84_vm10  ;;  %vm78_vm14 = vcmp.gt.f32.partialorder %v591_v3, 2.5  ;;  %vm85_vm15 = vcmp.lt.f32.partialorder %v591_v3, 4.5  ;;  %vm187_vm9 = vcmp.lt.s32.totalorder %v507_v1, 127 }
  0x28   :  { %vm678_vm13 = vmand %vm76_vm5, %vm83_vm6  ;;  %v690_v17 = vsel %vm674_vm4, %v118_v62, 0.0  ;;  %vm158_vm6 = vcmp.lt.s32.totalorder %v507_v1, 1  ;;  %vm216_vm10 = vcmp.lt.s32.totalorder %v507_v1, 2  ;;  %v491_v19 = vmov 1966171168  }
  0x29   :  { %v695_v18 = vsel %vm678_vm13, %v556_v50, 0.0  ;;  %vm697_vm5 = vmand %vm78_vm14, %vm85_vm15  ;;  %vm245_vm14 = vcmp.lt.s32.totalorder %v507_v1, 126 }
  0x2a   :  { %154 = vrot.lane.b32.xlu1 %v600_v4, %s488_s12  ;;  %156 = vrot.lane.b32.xlu0 %v604_v5, %s488_s12  ;;  %v707_v20 = vsel %vm697_vm5, %v122_v63, 0.0 }
  0x2e   :  { %177 = vrot.lane.b32.xlu1 %v561_v52, %s487_s0  ;;  %175 = vrot.lane.b32.xlu0 %v568_v55, %s487_s0 }
  0x32   :  { %181 = vrot.lane.b32.xlu1 %v588_v61, %s487_s0  ;;  %179 = vrot.lane.b32.xlu0 %v583_v60, %s487_s0 }
  0x36   :  { %185 = vrot.lane.b32.xlu1 %v604_v5, %s487_s0  ;;  %183 = vrot.lane.b32.xlu0 %v600_v4, %s487_s0 }
  0x3a   :  { %262 = vrot.lane.b32.xlu1 %v641_v8, %s488_s12  ;;  %260 = vrot.lane.b32.xlu0 %v646_v9, %s488_s12 }
  0x3e   :  { %266 = vrot.lane.b32.xlu1 %v667_v12, %s488_s12  ;;  %264 = vrot.lane.b32.xlu0 %v672_v14, %s488_s12 }
  0x42   :  { %270 = vrot.lane.b32.xlu1 %v690_v17, %s488_s12  ;;  %268 = vrot.lane.b32.xlu0 %v695_v18, %s488_s12 }
  0x46   :  { %202 = vrot.lane.b32.xlu1 %v545_v45, %s489_s13  ;;  %272 = vrot.lane.b32.xlu0 %v707_v20, %s488_s12 }
  0x4a   :  { %206 = vrot.lane.b32.xlu1 %v561_v52, %s489_s13  ;;  %204 = vrot.lane.b32.xlu0 %v568_v55, %s489_s13 }
  0x4e   :  { %210 = vrot.lane.b32.xlu1 %v588_v61, %s489_s13  ;;  %208 = vrot.lane.b32.xlu0 %v583_v60, %s489_s13 }
  0x52   :  { %214 = vrot.lane.b32.xlu1 %v604_v5, %s489_s13  ;;  %212 = vrot.lane.b32.xlu0 %v600_v4, %s489_s13 }
  0x56   :  { %290 = vrot.lane.b32.xlu1 %v641_v8, %s487_s0  ;;  %288 = vrot.lane.b32.xlu0 %v646_v9, %s487_s0 }
  0x5a   :  { %294 = vrot.lane.b32.xlu1 %v667_v12, %s487_s0  ;;  %292 = vrot.lane.b32.xlu0 %v672_v14, %s487_s0 }
  0x5e   :  { %298 = vrot.lane.b32.xlu1 %v690_v17, %s487_s0  ;;  %296 = vrot.lane.b32.xlu0 %v695_v18, %s487_s0 }
  0x62   :  { %231 = vrot.lane.b32.xlu1 %v545_v45, %s490_s14  ;;  %300 = vrot.lane.b32.xlu0 %v707_v20, %s487_s0 }
  0x66   :  { %235 = vrot.lane.b32.xlu1 %v561_v52, %s490_s14  ;;  %233 = vrot.lane.b32.xlu0 %v568_v55, %s490_s14 }
  0x6a   :  { %239 = vrot.lane.b32.xlu1 %v588_v61, %s490_s14  ;;  %237 = vrot.lane.b32.xlu0 %v583_v60, %s490_s14 }
  0x6e   :  { %243 = vrot.lane.b32.xlu1 %v604_v5, %s490_s14  ;;  %241 = vrot.lane.b32.xlu0 %v600_v4, %s490_s14 }
  0x90   :  { %v174_v21 = vpop.permute.xlu1 %173  ;;  %v145_v22 = vpop.permute.xlu0 %144 }
  0x94   :  { %v149_v23 = vpop.permute.xlu1 %148  ;;  %v147_v24 = vpop.permute.xlu0 %146 }
  0x95   :  { %v163_v25 = vsel %vm158_vm6, %v147_v24, %v149_v23  ;;  %v164_v26 = vsel %vm158_vm6, %v145_v22, %v147_v24 }
  0x96   :  { %v167_v0 = vadd.f32 %v164_v26, %v568_v55  ;;  %v168_v13 = vadd.f32 %v163_v25, %v561_v52 }
  0x98   :  { %v151_v27 = vpop.permute.xlu1 %150  ;;  %v153_v28 = vpop.permute.xlu0 %152 }
  0x99   :  { %v162_v29 = vsel %vm158_vm6, %v149_v23, %v151_v27  ;;  %v161_v30 = vsel %vm158_vm6, %v151_v27, %v153_v28 }
  0x9a   :  { %v169_v58 = vadd.f32 %v162_v29, %v583_v60  ;;  %v170_v52 = vadd.f32 %v161_v30, %v588_v61 }
  0x9c   :  { %v155_v31 = vpop.permute.xlu1 %154  ;;  %v157_v32 = vpop.permute.xlu0 %156 }
  0x9d   :  { %v159_v33 = vsel %vm158_vm6, %v155_v31, %v157_v32  ;;  %v165_v35 = vsel %vm158_vm6, %v157_v32, %v145_v22 }
  0x9e   :  { %v166_v36 = vadd.f32 %v165_v35, %v545_v45  ;;  %v172_v44 = vadd.f32 %v159_v33, %v604_v5 }
  0xa0   :  { %v178_v37 = vpop.permute.xlu1 %177  ;;  %v176_v38 = vpop.permute.xlu0 %175 }
  0xa1   :  { %v193_v39 = vsel %vm187_vm9, %v174_v21, %v176_v38 }
  0xa2   :  { %v756_v40 = vadd.f32 %v193_v39, %v166_v36 }
  0xa4   :  { %v182_v41 = vpop.permute.xlu1 %181  ;;  %v180_v43 = vpop.permute.xlu0 %179 }
  0xa5   :  { %v190_v2 = vsel %vm187_vm9, %v180_v43, %v182_v41  ;;  %v191_v56 = vsel %vm187_vm9, %v178_v37, %v180_v43 }
  0xa6   :  { %v197_v60 = vadd.f32 %v191_v56, %v168_v13  ;;  %v198_v29 = vadd.f32 %v190_v2, %v169_v58 }
  0xa8   :  { %v186_v48 = vpop.permute.xlu1 %185  ;;  %v184_v49 = vpop.permute.xlu0 %183 }
  0xa9   :  { %v194_v50 = vsel %vm187_vm9, %v186_v48, %v174_v21 }
  0xaa   :  { %v761_v51 = vadd.f32 %v194_v50, %v172_v44  ;;  %v160_v44 = vsel %vm158_vm6, %v153_v28, %v155_v31  ;;  %v192_v50 = vsel %vm187_vm9, %v176_v38, %v178_v37  ;;  %v188_v28 = vsel %vm187_vm9, %v184_v49, %v186_v48 }
  0xab   :  { %v189_v31 = vsel %vm187_vm9, %v182_v41, %v184_v49  ;;  %v171_v25 = vadd.f32 %v160_v44, %v600_v4  ;;  %v196_v26 = vadd.f32 %v192_v50, %v167_v0 }
  0xac   :  { %v263_v53 = vpop.permute.xlu1 %262  ;;  %v261_v45 = vpop.permute.xlu0 %260  ;;  %v199_v49 = vadd.f32 %v189_v31, %v170_v52 }
  0xad   :  { %v279_v55 = vsel %vm158_vm6, %v261_v45, %v263_v53  ;;  %v200_v3 = vadd.f32 %v188_v28, %v171_v25 }
  0xae   :  { %v282_v61 = vadd.f32 %v279_v55, %v641_v8 }
  0xb0   :  { %v267_v54 = vpop.permute.xlu1 %266  ;;  %v265_v57 = vpop.permute.xlu0 %264 }
  0xb1   :  { %v278_v37 = vsel %vm158_vm6, %v263_v53, %v265_v57  ;;  %v277_v48 = vsel %vm158_vm6, %v265_v57, %v267_v54 }
  0xb2   :  { %v283_v4 = vadd.f32 %v278_v37, %v672_v14  ;;  %v284_v56 = vadd.f32 %v277_v48, %v667_v12 }
  0xb4   :  { %v271_v59 = vpop.permute.xlu1 %270  ;;  %v269_v62 = vpop.permute.xlu0 %268 }
  0xb5   :  { %v276_v41 = vsel %vm158_vm6, %v267_v54, %v269_v62  ;;  %v275_v30 = vsel %vm158_vm6, %v269_v62, %v271_v59 }
  0xb6   :  { %v285_v58 = vadd.f32 %v276_v41, %v695_v18  ;;  %v286_v18 = vadd.f32 %v275_v30, %v690_v17 }
  0xb8   :  { %v203_v63 = vpop.permute.xlu1 %202  ;;  %v273_v22 = vpop.permute.xlu0 %272 }
  0xb9   :  { %v280_v0 = vsel %vm158_vm6, %v273_v22, %v261_v45  ;;  %v274_v2 = vsel %vm158_vm6, %v271_v59, %v273_v22 }
  0xba   :  { %v281_v54 = vadd.f32 %v280_v0, %v646_v9  ;;  %v287_v62 = vadd.f32 %v274_v2, %v707_v20 }
  0xbc   :  { %v207_v23 = vpop.permute.xlu1 %206  ;;  %v205_v24 = vpop.permute.xlu0 %204 }
  0xbd   :  { %v222_v13 = vsel %vm216_vm10, %v203_v63, %v205_v24  ;;  %v221_v57 = vsel %vm216_vm10, %v205_v24, %v207_v23 }
  0xbe   :  { %v225_v22 = vadd.f32 %v222_v13, %v196_v26 }
  0xc0   :  { %v211_v27 = vpop.permute.xlu1 %210  ;;  %v209_v32 = vpop.permute.xlu0 %208 }
  0xc1   :  { %v220_v59 = vsel %vm216_vm10, %v207_v23, %v209_v32  ;;  %v226_v23 = vadd.f32 %v221_v57, %v197_v60 }
  0xc2   :  { %v227_v28 = vadd.f32 %v220_v59, %v198_v29 }
  0xc4   :  { %v215_v5 = vpop.permute.xlu1 %214  ;;  %v213_v33 = vpop.permute.xlu0 %212 }
  0xc5   :  { %v223_v12 = vsel %vm216_vm10, %v215_v5, %v203_v63  ;;  %v218_v9 = vsel %vm216_vm10, %v211_v27, %v213_v33 }
  0xc6   :  { %v224_v63 = vadd.f32 %v223_v12, %v756_v40  ;;  %v229_v52 = vadd.f32 %v218_v9, %v200_v3 }
  0xc8   :  { %v291_v35 = vpop.permute.xlu1 %290  ;;  %v763_v36 = vpop.permute.xlu0 %288 }
  0xc9   :  { %v307_v8 = vsel %vm187_vm9, %v763_v36, %v291_v35 }
  0xca   :  { %v309_v44 = vadd.f32 %v307_v8, %v281_v54 }
  0xcc   :  { %v295_v21 = vpop.permute.xlu1 %294  ;;  %v293_v39 = vpop.permute.xlu0 %292  ;;  %v316_v40 = vsel %vm626_vm12, %v309_v44, 1.0 }
  0xcd   :  { %v306_v14 = vsel %vm187_vm9, %v291_v35, %v293_v39  ;;  %v219_v35 = vsel %vm216_vm10, %v209_v32, %v211_v27  ;;  %v305_v24 = vsel %vm187_vm9, %v293_v39, %v295_v21  ;;  %v217_v32 = vsel %vm216_vm10, %v213_v33, %v215_v5 }
  0xce   :  { %v310_v50 = vadd.f32 %v306_v14, %v282_v61  ;;  %v228_v55 = vadd.f32 %v219_v35, %v199_v49  ;;  %v311_v25 = vadd.f32 %v305_v24, %v283_v4  ;;  %v230_v61 = vadd.f32 %v217_v32, %v761_v51  ;;  %v919_v35 = vld [vmem:[#allocation10_spill] sm:$0xff] }
  0xcf   :  { %v355_v24 = vunpack.c.l.s4 %v491_v19 }
  0xd0   :  { %v299_v38 = vpop.permute.xlu1 %298  ;;  %v297_v43 = vpop.permute.xlu0 %296 }
  0xd1   :  { %v304_v17 = vsel %vm187_vm9, %v295_v21, %v297_v43  ;;  %v317_v21 = vsel %vm622_vm11, %v310_v50, 1.0  ;;  %v303_v60 = vsel %vm187_vm9, %v297_v43, %v299_v38  ;;  %v356_v50 = vunpack.c.0.s8 %v355_v24 }
  0xd2   :  { %v312_v5 = vadd.f32 %v304_v17, %v284_v56  ;;  %v313_v2 = vadd.f32 %v303_v60, %v285_v58  ;;  %v921_v17 = vld [vmem:[#allocation8_spill] sm:$0xff] }
  0xd4   :  { %v232_v53 = vpop.permute.xlu1 %231  ;;  %v301_v45 = vpop.permute.xlu0 %300  ;;  %v319_v46 = vsel %vm648_vm7, %v312_v5, 1.0  ;;  %v320_v12 = vsel %vm678_vm13, %v313_v2, 1.0 }
  0xd5   :  { %v302_v33 = vsel %vm187_vm9, %v299_v38, %v301_v45  ;;  %v308_v3 = vsel %vm187_vm9, %v301_v45, %v763_v36  ;;  %v318_v36 = vsel %vm652_vm8, %v311_v25, 1.0 }
  0xd6   :  { %v314_v4 = vadd.f32 %v302_v33, %v286_v18  ;;  %v315_v30 = vadd.f32 %v308_v3, %v287_v62  ;;  %v917_v62 = vld [vmem:[#allocation11_spill] sm:$0xff] }
  0xd8   :  { %v236_v20 = vpop.permute.xlu1 %235  ;;  %v234_v31 = vpop.permute.xlu0 %233  ;;  %v321_v42 = vsel %vm674_vm4, %v314_v4, 1.0  ;;  %v322_v47 = vsel %vm697_vm5, %v315_v30, 1.0 }
  0xd9   :  { %v250_v27 = vsel %vm245_vm14, %v234_v31, %v236_v20  ;;  %v251_v39 = vsel %vm245_vm14, %v232_v53, %v234_v31 }
  0xda   :  { %v253_v26 = vadd.f32 %v251_v39, %v224_v63  ;;  %v254_v37 = vadd.f32 %v250_v27, %v225_v22 }
  0xdc   :  { %v323_v29 = vsel %vm65_vm0, %v253_v26, %v316_v40  ;;  %v324_v7 = vsel %vm66_vm2, %v254_v37, %v317_v21  ;;  %v240_v48 = vpop.permute.xlu1 %239  ;;  %v238_v6 = vpop.permute.xlu0 %237  ;;  %vm920_vm2 = vcmp.lt.f32.partialorder %v919_v35, 2.5 }
  0xdd   :  { %v330_v41 = vmax.f32 %v323_v29, 1e-24  ;;  %v331_v49 = vmax.f32 %v324_v7, 1e-24  ;;  %v248_v43 = vsel %vm245_vm14, %v238_v6, %v240_v48  ;;  %v249_v38 = vsel %vm245_vm14, %v236_v20, %v238_v6  ;;  %v923_v7 = vld [vmem:[#allocation9_spill] sm:$0xff] }
  0xde   :  { %v255_v34 = vadd.f32 %v249_v38, %v226_v23  ;;  %v256_v0 = vadd.f32 %v248_v43, %v227_v28  ;;  %v359_v20 = vsub.s32 %v356_v50, %v921_v17  ;;  %v922_v29 = vlaneseq }
  0xdf   :  { %428 = vrsqrt.f32 %v330_v41 }
  0xe0   :  { %430 = vrsqrt.f32 %v331_v49  ;;  %v325_v13 = vsel %vm67_vm1, %v255_v34, %v318_v36  ;;  %v326_v56 = vsel %vm68_vm3, %v256_v0, %v319_v46  ;;  %v244_v51 = vpop.permute.xlu1 %243  ;;  %v242_v8 = vpop.permute.xlu0 %241  ;;  %vm918_vm1 = vcmp.lt.f32.partialorder %v917_v62, 2.5 }
  0xe1   :  { %v332_v11 = vmax.f32 %v325_v13, 1e-24  ;;  %v333_v14 = vmax.f32 %v326_v56, 1e-24  ;;  %v252_v45 = vsel %vm245_vm14, %v244_v51, %v232_v53  ;;  %v246_v10 = vsel %vm245_vm14, %v242_v8, %v244_v51  ;;  %v915_v53 = vld [vmem:[#allocation12_spill] sm:$0xff] }
  0xe2   :  { %v259_v54 = vadd.f32 %v252_v45, %v230_v61  ;;  %v247_v58 = vsel %vm245_vm14, %v240_v48, %v242_v8  ;;  %v258_v57 = vadd.f32 %v246_v10, %v229_v52  ;;  %vm916_vm0 = vcmp.lt.f32.partialorder %v915_v53, 2.5 }
  0xe3   :  { %432 = vrsqrt.f32 %v332_v11  ;;  %v257_v59 = vadd.f32 %v247_v58, %v228_v55  ;;  %vm403_vm3 = vcmp.lt.s32.totalorder %v922_v29, 896 }
  0xe4   :  { %434 = vrsqrt.f32 %v333_v14  ;;  %v329_v18 = vsel %vm916_vm0, %v259_v54, %v322_v47  ;;  %v328_v1 = vsel %vm918_vm1, %v258_v57, %v321_v42 }
  0xe5   :  { %v336_v22 = vmax.f32 %v329_v18, 1e-24  ;;  %v327_v15 = vsel %vm920_vm2, %v257_v59, %v320_v12  ;;  %v335_v9 = vmax.f32 %v328_v1, 1e-24 }
  0xe6   :  { %v334_v44 = vmax.f32 %v327_v15, 1e-24 }
  0xe7   :  { %436 = vrsqrt.f32 %v336_v22 }
  0xe8   :  { %438 = vrsqrt.f32 %v334_v44 }
  0xe9   :  { %440 = vrsqrt.f32 %v335_v9 }
  0xec   :  { %v429_v16 = vpop.eup %428 }
  0xed   :  { %v431_v23 = vpop.eup %430 }
  0xee   :  { %v351_v28 = vcombine.low %v429_v16, %v431_v23 }
  0xf0   :  { %v433_v63 = vpop.eup %432  ;;  %v360_v27 = vrot.slane %v351_v28, %v359_v20 }
  0xf1   :  { %v435_v31 = vpop.eup %434 }
  0xf2   :  { %v352_v55 = vcombine.low %v433_v63, %v435_v31 }
  0xf4   :  { %v437_v32 = vpop.eup %436  ;;  %v367_v39 = vrot.slane %v352_v55, %v359_v20 }
  0xf5   :  { %v439_v52 = vpop.eup %438  ;;  %v381_v21 = vrot.slane %v437_v32, %v359_v20 }
  0xf6   :  { %v441_v25 = vpop.eup %440  ;;  %v382_v26 = vcombine.low %v360_v27, %v367_v39 }
  0xf7   :  { %v353_v37 = vcombine.low %v439_v52, %v441_v25 }
  0xf8   :  { %v390_v5 = vrot.slane %v382_v26, %v359_v20 }
  0xf9   :  { %v374_v40 = vrot.slane %v353_v37, %v359_v20 }
  0xfb   :  { %v383_v60 = vcombine.low %v374_v40, %v381_v21 }
  0xfd   :  { %v397_v33 = vrot.slane %v383_v60, %v359_v20 }
  0xff   :  { %v398_v3 = vcombine.low %v390_v5, %v397_v33 }
 0x101   :  { %v400_v48 = vmul.f32 %v398_v3, %v923_v7 }
 0x103   :  { %405 = vst.msk [vmem:[#allocation5] sm:$0x7f] %vm403_vm3, %v400_v48 }
 0x104   :  { %473 = shalt.err (!%p470_p9)
}
 0x105   :  { %415 = dma.vmem_to_hbm [thread:$0]  %s413_s16, 112, %s886_s1, [#allocation4]  }
 0x106   :  { %484 = dma.done.wait [#allocation4], 112  }
 0x107   :  { %485 = vsyncadd [#allocation4], 4294967184 }
 0x108   :  { %419 = vsyncpa [#allocation3], 1 }
 0x109   :  { %420 = vsyncpa [#allocation4], 1 }

</bundles_post_ra>
